<compile_context>
chip_gen: v7x
topology: tpu7x:2x2x1
jax: 0.10.0
libtpu: 0.0.40
codegen_flags: <defaults>
</compile_context>

<pallas_src>
import functools

import numpy as np
import jax
import jax.numpy as jnp
from jax import lax
from jax.experimental import pallas as pl
from jax.experimental.pallas import tpu as pltpu


def _probe_low_half_parity():
    """Which u16 of a f32->2xu16 bitcast holds the LOW 16 bits (index 0 or 1)."""
    w = np.asarray(lax.bitcast_convert_type(jnp.uint32(0x00010002), jnp.uint16))
    return 0 if int(w[0]) == 0x0002 else 1


_LOW_HALF_PARITY = _probe_low_half_parity()


def _f32_to_f64_words_kernel(w_ref, out_ref, *, low_half_parity):
    # w_ref:   (TM, 2*TN) uint16 — the f32 block reinterpreted as 16-bit
    #          halves: x[r, k] occupies the adjacent lanes (2k, 2k+1).
    # out_ref: (TM, 2*TN) uint32 — little-endian f64 words (lo even, hi odd).
    w = w_ref[...].astype(jnp.uint32)
    n = w.shape[-1]

    lane = lax.broadcasted_iota(jnp.int32, w.shape, 1)
    is_out_low = (lane & 1) == 0                        # even column -> lo word
    if low_half_parity == 0:
        is_in_low = is_out_low                          # lane holds low 16 bits
    else:
        is_in_low = jnp.logical_not(is_out_low)

    # Reassemble the full 32-bit f32 pattern at every lane of a pair:
    #   contrib[c] = this lane's 16 bits, already at their final bit position
    #   partner[c] = contrib[c ^ 1]  (other half of the same f32), fetched
    #                with two XLU lane-rolls; the rolled iota tells — per lane
    #                and independent of the roll direction convention — which
    #                roll actually brought lane (c ^ 1)'s data here.
    contrib = jnp.where(is_in_low, w, w << 16)
    roll_a = pltpu.roll(contrib, shift=1, axis=1)
    roll_b = pltpu.roll(contrib, shift=n - 1, axis=1)
    lane_a = pltpu.roll(lane, shift=1, axis=1)
    a_is_partner = lane_a == (lane ^ 1)
    b = contrib | jnp.where(a_is_partner, roll_a, roll_b)

    # ----- exact IEEE-754 f32 -> f64, integer domain only -------------------
    s = b & jnp.uint32(0x80000000)                      # sign bit (in place)
    mag = b & jnp.uint32(0x7FFFFFFF)                    # exponent | mantissa
    is_e0 = mag < jnp.uint32(0x00800000)                # zero or subnormal
    is_special = mag >= jnp.uint32(0x7F800000)          # inf or nan

    # Subnormals: normalize the 23-bit mantissa with an exact int->f32 convert
    # (its result is never denormal, so this is immune to the VPU's FTZ).
    bm = pltpu.bitcast(
        pltpu.bitcast(mag, jnp.int32).astype(jnp.float32), jnp.uint32)
    frac = jnp.where(is_e0, bm, mag)                    # (exp|mantissa) field
    is_zero = frac == jnp.uint32(0)

    # Exponent re-bias folded into a single packed add on (frac >> 3):
    #   normal:     E64 = e + (1023 - 127)            -> +896  << 20
    #   subnormal:  E64 = e_norm + (1023 - 149 - 127) -> +747  << 20
    #   inf / nan:  E64 = 2047 = 255 + 1792           -> +1792 << 20
    #   +/- zero:   E64 = 0                           -> +0
    bias = jnp.where(
        is_e0,
        jnp.where(is_zero, jnp.uint32(0), jnp.uint32(747 << 20)),
        jnp.where(is_special, jnp.uint32(1792 << 20), jnp.uint32(896 << 20)),
    )
    hi_word = s | ((frac >> 3) + bias)
    lo_word = frac << 29

    out_ref[...] = jnp.where(is_out_low, lo_word, hi_word)


def _round_up(v, m):
    return ((v + m - 1) // m) * m


@jax.jit
def f32_to_f64_words(x):
    """float32 (M, N) -> uint32 (M, 2N): little-endian u32 words of float64(x)."""
    assert x.dtype == jnp.float32 and x.ndim == 2
    M, N = x.shape

    # Free, layout-only reinterpretation: (M, N) f32 -> (M, 2N) u16.  Each f32
    # now occupies two adjacent lanes, which is what lets the interleaved
    # (M, 2N) u32 output be produced without any in-kernel lane riffle.
    x16 = lax.bitcast_convert_type(x, jnp.uint16).reshape(M, 2 * N)

    # Fixed, lane-dense tiles (up to 2 MiB of input / 6 MiB in+out per step,
    # 12 MiB double-buffered); ragged last blocks handled via pl.cdiv.
    TM = min(512, _round_up(M, 16))
    TN = min(1024, _round_up(N, 128))
    grid = (pl.cdiv(M, TM), pl.cdiv(N, TN))
    spec = pl.BlockSpec((TM, 2 * TN), lambda i, j: (i, j))

    return pl.pallas_call(
        functools.partial(_f32_to_f64_words_kernel,
                          low_half_parity=_LOW_HALF_PARITY),
        out_shape=jax.ShapeDtypeStruct((M, 2 * N), jnp.uint32),
        grid=grid,
        in_specs=[spec],
        out_specs=spec,
        compiler_params=pltpu.CompilerParams(
            dimension_semantics=("parallel", "parallel"),
            vmem_limit_bytes=32 * 1024 * 1024,
        ),
        cost_estimate=pl.CostEstimate(
            flops=0, transcendentals=0, bytes_accessed=12 * M * N),
    )(x16)


def f32_to_f64(x):
    """Full forward pass: float32 (M, N) -> float64 (M, N) numpy array."""
    words = jax.block_until_ready(f32_to_f64_words(x))
    host = np.ascontiguousarray(np.asarray(words))      # single D2H copy
    return host.view(np.float64)                        # zero-copy reinterpret


if __name__ == "__main__":
    def _make_input(key, M, N):
        x = np.array(jax.random.normal(key, (M, N), dtype=jnp.float32),
                     dtype=np.float32)
        specials = np.array(
            [0.0, -0.0, np.inf, -np.inf, np.nan,
             1e-45,            # smallest positive subnormal
             -1.1754e-38,      # negative subnormal
             5e-39,            # mid-range subnormal
             1.1754944e-38,    # smallest normal
             3.4028235e38,     # near f32 max
             -1.0, 1.0],
            dtype=np.float32)
        x[0, :specials.size] = specials
        return x

    key = jax.random.PRNGKey(0)
    # One aligned shape and one ragged shape (exercises the cdiv / padded-edge path).
    for (M, N) in [(16, 256), (13, 200)]:
        key, sub = jax.random.split(key)
        x_np = _make_input(sub, M, N)
        x = jnp.asarray(x_np, dtype=jnp.float32)

        words = f32_to_f64_words(x)
        jax.block_until_ready(words)

        out_f64 = np.ascontiguousarray(np.asarray(words)).view(np.float64)
        ref_f64 = x_np.astype(np.float64)

        assert out_f64.dtype == np.float64 and out_f64.shape == (M, N)
        # Bit-exact comparison (f32 -> f64 is exact; also covers NaN payloads).
        if not np.array_equal(out_f64.view(np.uint64), ref_f64.view(np.uint64)):
            bad = np.nonzero(out_f64.view(np.uint64) != ref_f64.view(np.uint64))
            raise AssertionError(
                f"f32->f64 conversion mismatch for shape {(M, N)} at {bad}")

    print("KERNEL_OK")
</pallas_src>

<mosaic_0001>
module attributes {stable_mosaic.version = 11 : i64} {
  func.func @_f32_to_f64_words_kernel(%arg0: i32, %arg1: i32, %arg2: memref<16x512xi16, #tpu.memory_space<vmem>>, %arg3: memref<16x512xi32, #tpu.memory_space<vmem>>) attributes {dimension_semantics = [#tpu.dimension_semantics<parallel>, #tpu.dimension_semantics<parallel>], iteration_bounds = array<i64: 1, 1>, scalar_prefetch = 0 : i64, scratch_operands = 0 : i64, tpu.core_type = #tpu.core_type<tc>, window_params = [{transform_indices = @transform_0, window_bounds = array<i64: 16, 512>}, {transform_indices = @transform_1, window_bounds = array<i64: 16, 512>}]} {
    %c0 = arith.constant 0 : index
    %c0_0 = arith.constant 0 : index
    %0 = vector.load %arg2[%c0, %c0_0] : memref<16x512xi16, #tpu.memory_space<vmem>>, vector<16x512xi16>
    %1 = arith.extui %0 : vector<16x512xi16> to vector<16x512xi32>
    %2 = tpu.iota {dimensions = array<i32: 1>} : vector<16x512xi32>
    %c1_i32 = arith.constant 1 : i32
    %3 = vector.broadcast %c1_i32 : i32 to vector<16x512xi32>
    %4 = arith.andi %2, %3 : vector<16x512xi32>
    %c0_i32 = arith.constant 0 : i32
    %5 = vector.broadcast %c0_i32 : i32 to vector<16x512xi32>
    %6 = arith.cmpi eq, %4, %5 : vector<16x512xi32>
    %c16_i32 = arith.constant 16 : i32
    %7 = vector.broadcast %c16_i32 : i32 to vector<16x512xi32>
    %8 = arith.shli %1, %7 : vector<16x512xi32>
    %9 = arith.select %6, %1, %8 : vector<16x512xi1>, vector<16x512xi32>
    %c1_i32_1 = arith.constant 1 : i32
    %10 = tpu.dynamic_rotate %9 by %c1_i32_1 dim 1 : vector<16x512xi32>, i32 -> vector<16x512xi32>
    %c511_i32 = arith.constant 511 : i32
    %11 = tpu.dynamic_rotate %9 by %c511_i32 dim 1 : vector<16x512xi32>, i32 -> vector<16x512xi32>
    %c1_i32_2 = arith.constant 1 : i32
    %12 = tpu.dynamic_rotate %2 by %c1_i32_2 dim 1 : vector<16x512xi32>, i32 -> vector<16x512xi32>
    %c1_i32_3 = arith.constant 1 : i32
    %13 = vector.broadcast %c1_i32_3 : i32 to vector<16x512xi32>
    %14 = arith.xori %2, %13 : vector<16x512xi32>
    %15 = arith.cmpi eq, %12, %14 : vector<16x512xi32>
    %16 = arith.select %15, %10, %11 : vector<16x512xi1>, vector<16x512xi32>
    %17 = arith.ori %9, %16 : vector<16x512xi32>
    %c-2147483648_i32 = arith.constant -2147483648 : i32
    %18 = vector.broadcast %c-2147483648_i32 : i32 to vector<16x512xi32>
    %19 = arith.andi %17, %18 : vector<16x512xi32>
    %c2147483647_i32 = arith.constant 2147483647 : i32
    %20 = vector.broadcast %c2147483647_i32 : i32 to vector<16x512xi32>
    %21 = arith.andi %17, %20 : vector<16x512xi32>
    %c8388608_i32 = arith.constant 8388608 : i32
    %22 = vector.broadcast %c8388608_i32 : i32 to vector<16x512xi32>
    %23 = arith.cmpi ult, %21, %22 : vector<16x512xi32>
    %c2139095040_i32 = arith.constant 2139095040 : i32
    %24 = vector.broadcast %c2139095040_i32 : i32 to vector<16x512xi32>
    %25 = arith.cmpi uge, %21, %24 : vector<16x512xi32>
    %26 = tpu.bitcast %21 : vector<16x512xi32> -> vector<16x512xi32>
    %27 = arith.sitofp %26 : vector<16x512xi32> to vector<16x512xf32>
    %28 = tpu.bitcast %27 : vector<16x512xf32> -> vector<16x512xi32>
    %29 = arith.select %23, %28, %21 : vector<16x512xi1>, vector<16x512xi32>
    %c0_i32_4 = arith.constant 0 : i32
    %30 = vector.broadcast %c0_i32_4 : i32 to vector<16x512xi32>
    %31 = arith.cmpi eq, %29, %30 : vector<16x512xi32>
    %c0_i32_5 = arith.constant 0 : i32
    %c783286272_i32 = arith.constant 783286272 : i32
    %32 = vector.broadcast %c0_i32_5 : i32 to vector<16x512xi32>
    %33 = vector.broadcast %c783286272_i32 : i32 to vector<16x512xi32>
    %34 = arith.select %31, %32, %33 : vector<16x512xi1>, vector<16x512xi32>
    %c1879048192_i32 = arith.constant 1879048192 : i32
    %c939524096_i32 = arith.constant 939524096 : i32
    %35 = vector.broadcast %c1879048192_i32 : i32 to vector<16x512xi32>
    %36 = vector.broadcast %c939524096_i32 : i32 to vector<16x512xi32>
    %37 = arith.select %25, %35, %36 : vector<16x512xi1>, vector<16x512xi32>
    %38 = arith.select %23, %34, %37 : vector<16x512xi1>, vector<16x512xi32>
    %c3_i32 = arith.constant 3 : i32
    %39 = vector.broadcast %c3_i32 : i32 to vector<16x512xi32>
    %40 = arith.shrui %29, %39 : vector<16x512xi32>
    %41 = arith.addi %40, %38 : vector<16x512xi32>
    %42 = arith.ori %19, %41 : vector<16x512xi32>
    %c29_i32 = arith.constant 29 : i32
    %43 = vector.broadcast %c29_i32 : i32 to vector<16x512xi32>
    %44 = arith.shli %29, %43 : vector<16x512xi32>
    %45 = arith.select %6, %44, %42 : vector<16x512xi1>, vector<16x512xi32>
    %c0_6 = arith.constant 0 : index
    %c0_7 = arith.constant 0 : index
    %46 = vector.load %arg3[%c0_6, %c0_7] : memref<16x512xi32, #tpu.memory_space<vmem>>, vector<16x512xi32>
    tpu.vector_store %arg3[%c0_6, %c0_7], %45 {strides = array<i32>} : memref<16x512xi32, #tpu.memory_space<vmem>>, vector<16x512xi32>,
    return
  }
  func.func @transform_0(%arg0: i32, %arg1: i32) -> (i32, i32) {
    %c0_i32 = arith.constant 0 : i32
    return %arg0, %arg1 : i32, i32
  }
  func.func @transform_1(%arg0: i32, %arg1: i32) -> (i32, i32) {
    %c0_i32 = arith.constant 0 : i32
    return %arg0, %arg1 : i32, i32
  }
}

</mosaic_0001>

<bundles_post_ra>
// kernel: f32_to_f64_words.1
= control target key start
LH: loop header
LB: loop body
LE: loop exit
PB: predicated region body
PF: predicated region fallthrough
CT: control target
= control target key end

     0   :  { %v29_v0 = vlaneseq  ;;  %s613_s0 = inlined_call_operand.vmem [shape: u16[16,512], index: 0, kind: input, shape index: {}]   ;;  %s614_s1 = inlined_call_operand.hbm [shape: u32[16,512], index: 1, kind: output, shape index: {}]  }
   0x1   :  { %v9_v1 = vld [vmem:[%s613_s0] sm:$0xff]  ;;  %v11_v2 = vld [vmem:[%s613_s0 + $0x10] sm:$0xff] }
   0x2   :  { %v13_v3 = vunpack.c.l.b16 %v9_v1  ;;  %v17_v4 = vunpack.c.l.b16 %v11_v2  ;;  %v14_v5 = vunpack.c.h.b16 %v9_v1 }
   0x3   :  { %6 = vsyncpa [#allocation3], 0  ;;  %v350_v6 = vand.u32 127, %v29_v0  ;;  %v10_v7 = vld [vmem:[%s613_s0 + $0x8] sm:$0xff]  ;;  %v18_v10 = vunpack.c.h.b16 %v11_v2  ;;  %s327_s12 = smov 1   ;;  %v12_v14 = vld [vmem:[%s613_s0 + $0x18] sm:$0xff] }
   0x4   :  { %v21_v8 = vand.u32 65535, %v13_v3  ;;  %v25_v9 = vand.u32 65535, %v17_v4  ;;  %v22_v16 = vand.u32 65535, %v14_v5  ;;  %v15_v17 = vunpack.c.l.b16 %v10_v7  ;;  %s328_s0 = smov 127   ;;  %s331_s15 = smov [#allocation2]  }
   0x5   :  { %108 = vrot.lane.b32.xlu0 %v350_v6, %s327_s12  ;;  %v358_v11 = vadd.s32 256, %v350_v6  ;;  %v361_v12 = vadd.s32 128, %v350_v6  ;;  %v34_v13 = vand.u32 1, %v350_v6  ;;  %v370_v18 = vadd.s32 384, %v350_v6  ;;  %s285_s16 = sshll.u32 %s331_s15, 4  ;;  %s286_s16 = int_to_ptr.vmem [resolvable:$true] %s285_s16 }
   0x6   :  { %v42_v15 = vshll.u32 %v21_v8, 16  ;;  %v46_v21 = vshll.u32 %v25_v9, 16  ;;  %v26_v22 = vand.u32 65535, %v18_v10  ;;  %v19_v23 = vunpack.c.l.b16 %v12_v14  ;;  %s303_s17 = scalar_lea.vmem %s286_s16, 1024  ;;  %p308_p1 = scmp.lt.s32.totalorder %s286_s16, %s286_s16 }
   0x7   :  { %112 = vrot.lane.b32.xlu1 %v358_v11, %s327_s12  ;;  %vm372_vm0 = vcmp.eq.s32.totalorder %v34_v13, 0  ;;  %v35_v20 = vand.u32 1, %v361_v12  ;;  %v43_v25 = vshll.u32 %v22_v16, 16  ;;  %v23_v26 = vand.u32 65535, %v15_v17  ;;  %p304_p0 = scmp.ne.s32.totalorder %s286_s16, %s303_s17  ;;  %p309_p2 = scmp.lt.s32.totalorder %s303_s17, %s303_s17 }
   0x8   :  { %v381_v24 = vsel %vm372_vm0, %v21_v8, %v42_v15  ;;  %v16_v27 = vunpack.c.h.b16 %v10_v7  ;;  %v36_v29 = vand.u32 1, %v358_v11  ;;  %v392_v30 = vsel %vm372_vm0, %v25_v9, %v46_v21 }
   0x9   :  { %110 = vrot.lane.b32.xlu0 %v361_v12, %s327_s12  ;;  %vm385_vm1 = vcmp.eq.s32.totalorder %v35_v20, 0  ;;  %v47_v31 = vshll.u32 %v26_v22, 16  ;;  %v27_v32 = vand.u32 65535, %v19_v23  ;;  %v20_v33 = vunpack.c.h.b16 %v12_v14  ;;  %p310_p3 = por %p309_p2, %p308_p1 }
   0xa   :  { %v398_v34 = vsel %vm385_vm1, %v22_v16, %v43_v25  ;;  %v44_v35 = vshll.u32 %v23_v26, 16  ;;  %v24_v36 = vand.u32 65535, %v16_v27  ;;  %vm402_vm2 = vcmp.eq.s32.totalorder %v36_v29, 0 }
   0xb   :  { %114 = vrot.lane.b32.xlu1 %v370_v18, %s327_s12  ;;  %v37_v38 = vand.u32 1, %v370_v18  ;;  %v409_v39 = vsel %vm385_vm1, %v26_v22, %v47_v31  ;;  %v48_v40 = vshll.u32 %v27_v32, 16  ;;  %v28_v41 = vand.u32 65535, %v20_v33  ;;  %p311_p4 = pnand %p310_p3, %p304_p0 }
   0xc   :  { %v415_v42 = vsel %vm402_vm2, %v23_v26, %v44_v35  ;;  %v45_v43 = vshll.u32 %v24_v36, 16  ;;  %vm74_vm4 = vcmp.lt.s32.totalorder %v350_v6, 1  ;;  %v122_v51 = vxor.u32 1, %v358_v11 }
   0xd   :  { %58 = vrot.lane.b32.xlu0 %v381_v24, %s327_s12  ;;  %vm419_vm3 = vcmp.eq.s32.totalorder %v37_v38, 0  ;;  %v425_v45 = vsel %vm402_vm2, %v27_v32, %v48_v40  ;;  %v49_v46 = vshll.u32 %v28_v41, 16  ;;  %v121_v52 = vxor.u32 1, %v361_v12 }
   0xe   :  { %v431_v47 = vsel %vm419_vm3, %v24_v36, %v45_v43  ;;  %v123_v54 = vxor.u32 1, %v370_v18  ;;  %v120_v8 = vxor.u32 1, %v350_v6  ;;  %vm99_vm8 = vcmp.lt.s32.totalorder %v350_v6, 127 }
   0xf   :  { %60 = vrot.lane.b32.xlu1 %v392_v30, %s327_s12  ;;  %v437_v48 = vsel %vm419_vm3, %v28_v41, %v49_v46 }
  0x11   :  { %62 = vrot.lane.b32.xlu0 %v398_v34, %s327_s12 }
  0x13   :  { %64 = vrot.lane.b32.xlu1 %v409_v39, %s327_s12 }
  0x15   :  { %66 = vrot.lane.b32.xlu0 %v415_v42, %s327_s12 }
  0x17   :  { %68 = vrot.lane.b32.xlu1 %v425_v45, %s327_s12 }
  0x19   :  { %70 = vrot.lane.b32.xlu0 %v431_v47, %s327_s12 }
  0x1b   :  { %72 = vrot.lane.b32.xlu1 %v437_v48, %s327_s12 }
  0x1d   :  { %83 = vrot.lane.b32.xlu0 %v381_v24, %s328_s0 }
  0x1f   :  { %85 = vrot.lane.b32.xlu1 %v392_v30, %s328_s0 }
  0x21   :  { %87 = vrot.lane.b32.xlu0 %v398_v34, %s328_s0 }
  0x23   :  { %89 = vrot.lane.b32.xlu1 %v409_v39, %s328_s0 }
  0x25   :  { %91 = vrot.lane.b32.xlu0 %v415_v42, %s328_s0 }
  0x27   :  { %93 = vrot.lane.b32.xlu1 %v425_v45, %s328_s0 }
  0x29   :  { %95 = vrot.lane.b32.xlu0 %v431_v47, %s328_s0 }
  0x2b   :  { %97 = vrot.lane.b32.xlu1 %v437_v48, %s328_s0 }
  0x77   :  { %v109_v49 = vpop.permute.xlu0 %108 }
  0x79   :  { %v113_v50 = vpop.permute.xlu1 %112 }
  0x7b   :  { %v111_v53 = vpop.permute.xlu0 %110 }
  0x7c   :  { %v117_v55 = vsel %vm74_vm4, %v111_v53, %v113_v50  ;;  %v118_v56 = vsel %vm74_vm4, %v109_v49, %v111_v53 }
  0x7d   :  { %vm459_vm5 = vcmp.eq.s32.totalorder %v118_v56, %v121_v52  ;;  %vm463_vm6 = vcmp.eq.s32.totalorder %v117_v55, %v122_v51  ;;  %v115_v59 = vpop.permute.xlu1 %114  ;;  %v329_v52 = vmov 783286272  }
  0x7e   :  { %v116_v60 = vsel %vm74_vm4, %v113_v50, %v115_v59  ;;  %v119_v9 = vsel %vm74_vm4, %v115_v59, %v109_v49 }
  0x7f   :  { %vm469_vm7 = vcmp.eq.s32.totalorder %v116_v60, %v123_v54  ;;  %v59_v62 = vpop.permute.xlu0 %58  ;;  %vm124_vm9 = vcmp.eq.s32.totalorder %v119_v9, %v120_v8  ;;  %v330_v54 = vmov 939524096  }
  0x81   :  { %v61_v63 = vpop.permute.xlu1 %60 }
  0x83   :  { %v63_v0 = vpop.permute.xlu0 %62 }
  0x84   :  { %v79_v22 = vsel %vm74_vm4, %v59_v62, %v63_v0 }
  0x85   :  { %v65_v1 = vpop.permute.xlu1 %64 }
  0x86   :  { %v80_v27 = vsel %vm74_vm4, %v61_v63, %v65_v1 }
  0x87   :  { %v67_v2 = vpop.permute.xlu0 %66 }
  0x89   :  { %v69_v3 = vpop.permute.xlu1 %68 }
  0x8a   :  { %v500_v29 = vsel %vm74_vm4, %v65_v1, %v69_v3 }
  0x8b   :  { %v71_v4 = vpop.permute.xlu0 %70 }
  0x8c   :  { %v81_v12 = vsel %vm74_vm4, %v71_v4, %v59_v62 }
  0x8d   :  { %v73_v5 = vpop.permute.xlu1 %72 }
  0x8e   :  { %v82_v16 = vsel %vm74_vm4, %v73_v5, %v61_v63  ;;  %v510_v33 = vsel %vm74_vm4, %v69_v3, %v73_v5 }
  0x8f   :  { %v84_v7 = vpop.permute.xlu0 %83 }
  0x91   :  { %v476_v10 = vpop.permute.xlu1 %85 }
  0x93   :  { %v88_v11 = vpop.permute.xlu0 %87 }
  0x94   :  { %v104_v13 = vsel %vm99_vm8, %v84_v7, %v88_v11 }
  0x95   :  { %v128_v14 = vsel %vm124_vm9, %v81_v12, %v104_v13  ;;  %v90_v15 = vpop.permute.xlu1 %89 }
  0x96   :  { %v136_v17 = vor.u32 %v128_v14, %v381_v24  ;;  %v105_v18 = vsel %vm99_vm8, %v476_v10, %v90_v15  ;;  %v77_v24 = vsel %vm74_vm4, %v63_v0, %v67_v2 }
  0x97   :  { %v132_v20 = vsel %vm124_vm9, %v82_v16, %v105_v18  ;;  %v92_v21 = vpop.permute.xlu0 %91 }
  0x98   :  { %v152_v23 = vand.u32 2147483647, %v136_v17  ;;  %v140_v25 = vor.u32 %v132_v20, %v392_v30  ;;  %v102_v26 = vsel %vm99_vm8, %v88_v11, %v92_v21  ;;  %v75_v30 = vsel %vm74_vm4, %v67_v2, %v71_v4 }
  0x99   :  { %v129_v31 = vsel %vm459_vm5, %v79_v22, %v102_v26  ;;  %v504_v32 = vpop.permute.xlu1 %93  ;;  %v144_v43 = vand.u32 2147483648, %v136_v17 }
  0x9a   :  { %vm160_vm10 = vcmp.lt.u32.totalorder %v152_v23, 8388608  ;;  %v176_v35 = vcvt.s32.f32 %v152_v23  ;;  %vm168_vm11 = vcmp.ge.u32.totalorder %v152_v23, 2139095040  ;;  %v156_v36 = vand.u32 2147483647, %v140_v25 }
  0x9b   :  { %v513_v38 = vor.u32 %v129_v31, %v398_v34  ;;  %v103_v40 = vsel %vm99_vm8, %v90_v15, %v504_v32  ;;  %v96_v41 = vpop.permute.xlu0 %95  ;;  %v216_v55 = vsel %vm168_vm11, 1879048192, %v330_v54 }
  0x9c   :  { %v192_v46 = vsel %vm160_vm10, %v176_v35, %v152_v23  ;;  %v133_v49 = vsel %vm459_vm5, %v80_v27, %v103_v40  ;;  %v100_v50 = vsel %vm99_vm8, %v92_v21, %v96_v41  ;;  %vm164_vm13 = vcmp.lt.u32.totalorder %v156_v36, 8388608 }
  0x9d   :  { %vm200_vm12 = vcmp.eq.s32.totalorder %v192_v46, 0  ;;  %v232_v51 = vshrl.u32 %v192_v46, 3  ;;  %v106_v34 = vsel %vm99_vm8, %v96_v41, %v84_v7  ;;  %vm172_vm14 = vcmp.ge.u32.totalorder %v156_v36, 2139095040 }
  0x9e   :  { %v208_v53 = vsel %vm200_vm12, 0, %v329_v52  ;;  %v180_v56 = vcvt.s32.f32 %v156_v36  ;;  %v256_v59 = vshll.u32 %v192_v46, 29  ;;  %v153_v60 = vand.u32 2147483647, %v513_v38 }
  0x9f   :  { %v224_v57 = vsel %vm160_vm10, %v208_v53, %v216_v55  ;;  %v141_v62 = vor.u32 %v133_v49, %v409_v39  ;;  %v130_v1 = vsel %vm463_vm6, %v77_v24, %v100_v50  ;;  %v131_v2 = vsel %vm469_vm7, %v75_v30, %v106_v34 }
  0xa0   :  { %v240_v63 = vadd.s32 %v232_v51, %v224_v57  ;;  %v196_v0 = vsel %vm164_vm13, %v180_v56, %v156_v36  ;;  %v220_v3 = vsel %vm172_vm14, 1879048192, %v330_v54  ;;  %vm161_vm4 = vcmp.lt.u32.totalorder %v153_v60, 8388608 }
  0xa1   :  { %vm204_vm15 = vcmp.eq.s32.totalorder %v196_v0, 0  ;;  %v236_v4 = vshrl.u32 %v196_v0, 3  ;;  %vm169_vm5 = vcmp.ge.u32.totalorder %v153_v60, 2139095040  ;;  %v177_v8 = vcvt.s32.f32 %v153_v60 }
  0xa2   :  { %v248_v5 = vor.u32 %v240_v63, %v144_v43  ;;  %v212_v7 = vsel %vm204_vm15, 0, %v329_v52  ;;  %v148_v39 = vand.u32 2147483648, %v140_v25  ;;  %v260_v11 = vshll.u32 %v196_v0, 29 }
  0xa3   :  { %v228_v9 = vsel %vm164_vm13, %v212_v7, %v220_v3  ;;  %v157_v12 = vand.u32 2147483647, %v141_v62  ;;  %v193_v15 = vsel %vm161_vm4, %v177_v8, %v153_v60  ;;  %v543_v16 = vor.u32 %v130_v1, %v415_v42 }
  0xa4   :  { %v264_v13 = vsel %vm372_vm0, %v256_v59, %v248_v5  ;;  %v244_v14 = vadd.s32 %v236_v4, %v228_v9  ;;  %vm201_vm9 = vcmp.eq.s32.totalorder %v193_v15, 0  ;;  %v217_v17 = vsel %vm169_vm5, 1879048192, %v330_v54 }
  0xa5   :  { %272 = vst [vmem:[#allocation2] sm:$0xff] %v264_v13  ;;  %v233_v18 = vshrl.u32 %v193_v15, 3  ;;  %vm165_vm10 = vcmp.lt.u32.totalorder %v157_v12, 8388608  ;;  %v209_v21 = vsel %vm201_vm9, 0, %v329_v52  ;;  %vm173_vm11 = vcmp.ge.u32.totalorder %v157_v12, 2139095040 }
  0xa6   :  { %v252_v20 = vor.u32 %v244_v14, %v148_v39  ;;  %v181_v22 = vcvt.s32.f32 %v157_v12  ;;  %v145_v23 = vand.u32 2147483648, %v513_v38  ;;  %v225_v25 = vsel %vm161_vm4, %v209_v21, %v217_v17  ;;  %v98_v38 = vpop.permute.xlu1 %97 }
  0xa7   :  { %v149_v26 = vand.u32 2147483648, %v141_v62  ;;  %v139_v27 = vor.u32 %v131_v2, %v431_v47  ;;  %v241_v24 = vadd.s32 %v233_v18, %v225_v25  ;;  %v154_v30 = vand.u32 2147483647, %v543_v16 }
  0xa8   :  { %v268_v42 = vsel %vm372_vm0, %v260_v11, %v252_v20  ;;  %v197_v31 = vsel %vm165_vm10, %v181_v22, %v157_v12  ;;  %v257_v35 = vshll.u32 %v193_v15, 29  ;;  %v221_v36 = vsel %vm173_vm11, 1879048192, %v330_v54 }
  0xa9   :  { %276 = vst [vmem:[#allocation2 + $0x20] sm:$0xff] %v268_v42  ;;  %vm205_vm12 = vcmp.eq.s32.totalorder %v197_v31, 0  ;;  %v237_v40 = vshrl.u32 %v197_v31, 3  ;;  %v249_v41 = vor.u32 %v241_v24, %v145_v23  ;;  %v155_v46 = vand.u32 2147483647, %v139_v27 }
  0xaa   :  { %v213_v43 = vsel %vm205_vm12, 0, %v329_v52  ;;  %vm162_vm13 = vcmp.lt.u32.totalorder %v154_v30, 8388608  ;;  %v146_v47 = vand.u32 2147483648, %v543_v16  ;;  %vm170_vm0 = vcmp.ge.u32.totalorder %v154_v30, 2139095040 }
  0xab   :  { %v229_v19 = vsel %vm165_vm10, %v213_v43, %v221_v36  ;;  %v178_v49 = vcvt.s32.f32 %v154_v30  ;;  %v265_v50 = vsel %vm385_vm1, %v257_v35, %v249_v41  ;;  %vm163_vm14 = vcmp.lt.u32.totalorder %v155_v46, 8388608 }
  0xac   :  { %v245_v51 = vadd.s32 %v237_v40, %v229_v19  ;;  %v101_v34 = vsel %vm99_vm8, %v504_v32, %v98_v38  ;;  %273 = vst [vmem:[#allocation2 + $0x8] sm:$0xff] %v265_v50  ;;  %v261_v53 = vshll.u32 %v197_v31, 29  ;;  %vm171_vm15 = vcmp.ge.u32.totalorder %v155_v46, 2139095040 }
  0xad   :  { %v179_v55 = vcvt.s32.f32 %v155_v46  ;;  %v194_v56 = vsel %vm162_vm13, %v178_v49, %v154_v30  ;;  %v218_v59 = vsel %vm170_vm0, 1879048192, %v330_v54  ;;  %v107_v0 = vsel %vm99_vm8, %v98_v38, %v476_v10 }
  0xae   :  { %v253_v57 = vor.u32 %v245_v51, %v149_v26  ;;  %vm202_vm4 = vcmp.eq.s32.totalorder %v194_v56, 0  ;;  %v234_v60 = vshrl.u32 %v194_v56, 3  ;;  %v134_v32 = vsel %vm463_vm6, %v500_v29, %v101_v34 }
  0xaf   :  { %v195_v62 = vsel %vm163_vm14, %v179_v55, %v155_v46  ;;  %v210_v63 = vsel %vm202_vm4, 0, %v329_v52  ;;  %v219_v5 = vsel %vm171_vm15, 1879048192, %v330_v54  ;;  %v135_v6 = vsel %vm469_vm7, %v510_v33, %v107_v0 }
  0xb0   :  { %v269_v1 = vsel %vm385_vm1, %v261_v53, %v253_v57  ;;  %vm203_vm5 = vcmp.eq.s32.totalorder %v195_v62, 0  ;;  %v226_v2 = vsel %vm162_vm13, %v210_v63, %v218_v59  ;;  %v235_v3 = vshrl.u32 %v195_v62, 3 }
  0xb1   :  { %277 = vst [vmem:[#allocation2 + $0x28] sm:$0xff] %v269_v1  ;;  %v211_v4 = vsel %vm203_vm5, 0, %v329_v52  ;;  %v242_v7 = vadd.s32 %v234_v60, %v226_v2  ;;  %v142_v28 = vor.u32 %v134_v32, %v425_v45  ;;  %v143_v10 = vor.u32 %v135_v6, %v437_v48 }
  0xb2   :  { %v227_v58 = vsel %vm163_vm14, %v211_v4, %v219_v5  ;;  %v147_v29 = vand.u32 2147483648, %v139_v27  ;;  %v258_v9 = vshll.u32 %v194_v56, 29  ;;  %v259_v14 = vshll.u32 %v195_v62, 29 }
  0xb3   :  { %v243_v8 = vadd.s32 %v235_v3, %v227_v58  ;;  %v250_v39 = vor.u32 %v242_v7, %v146_v47  ;;  %v158_v11 = vand.u32 2147483647, %v142_v28  ;;  %v159_v12 = vand.u32 2147483647, %v143_v10 }
  0xb4   :  { %v150_v27 = vand.u32 2147483648, %v142_v28  ;;  %v151_v42 = vand.u32 2147483648, %v143_v10 }
  0xb5   :  { %v251_v13 = vor.u32 %v243_v8, %v147_v29  ;;  %v266_v15 = vsel %vm402_vm2, %v258_v9, %v250_v39  ;;  %vm166_vm1 = vcmp.lt.u32.totalorder %v158_v11, 8388608  ;;  %vm167_vm6 = vcmp.lt.u32.totalorder %v159_v12, 8388608 }
  0xb6   :  { %274 = vst [vmem:[#allocation2 + $0x10] sm:$0xff] %v266_v15  ;;  %v182_v45 = vcvt.s32.f32 %v158_v11  ;;  %v183_v33 = vcvt.s32.f32 %v159_v12  ;;  %vm174_vm7 = vcmp.ge.u32.totalorder %v158_v11, 2139095040  ;;  %vm175_vm8 = vcmp.ge.u32.totalorder %v159_v12, 2139095040 }
  0xb7   :  { %v267_v61 = vsel %vm419_vm3, %v259_v14, %v251_v13  ;;  %v222_v22 = vsel %vm174_vm7, 1879048192, %v330_v54  ;;  %v223_v23 = vsel %vm175_vm8, 1879048192, %v330_v54 }
  0xb8   :  { %275 = vst [vmem:[#allocation2 + $0x18] sm:$0xff] %v267_v61  ;;  %v198_v48 = vsel %vm166_vm1, %v182_v45, %v158_v11  ;;  %v199_v16 = vsel %vm167_vm6, %v183_v33, %v159_v12 }
  0xb9   :  { %vm206_vm9 = vcmp.eq.s32.totalorder %v198_v48, 0  ;;  %vm207_vm10 = vcmp.eq.s32.totalorder %v199_v16, 0  ;;  %v238_v17 = vshrl.u32 %v198_v48, 3  ;;  %v239_v18 = vshrl.u32 %v199_v16, 3 }
  0xba   :  { %v214_v20 = vsel %vm206_vm9, 0, %v329_v52  ;;  %v215_v21 = vsel %vm207_vm10, 0, %v329_v52  ;;  %v262_v36 = vshll.u32 %v198_v48, 29  ;;  %v263_v40 = vshll.u32 %v199_v16, 29 }
  0xbb   :  { %v230_v25 = vsel %vm166_vm1, %v214_v20, %v222_v22  ;;  %v231_v26 = vsel %vm167_vm6, %v215_v21, %v223_v23 }
  0xbc   :  { %v246_v24 = vadd.s32 %v238_v17, %v230_v25  ;;  %v247_v31 = vadd.s32 %v239_v18, %v231_v26 }
  0xbe   :  { %v254_v30 = vor.u32 %v246_v24, %v150_v27  ;;  %v255_v35 = vor.u32 %v247_v31, %v151_v42 }
  0xc0   :  { %v270_v52 = vsel %vm402_vm2, %v262_v36, %v254_v30  ;;  %v271_v54 = vsel %vm419_vm3, %v263_v40, %v255_v35 }
  0xc1   :  { %278 = vst [vmem:[#allocation2 + $0x30] sm:$0xff] %v270_v52  ;;  %279 = vst [vmem:[#allocation2 + $0x38] sm:$0xff] %v271_v54 }
  0xc2   :  { %314 = shalt.err (!%p311_p4)
}
  0xc3   :  { %s315_s20 = scalar_lea.hbm %s614_s1, 1024 }
  0xc4   :  { %p316_p5 = scmp.ne.s32.totalorder %s614_s1, %s315_s20  ;;  %p319_p6 = scmp.lt.u32.totalorder %s315_s20, %s614_s1 }
  0xc6   :  { %p321_p7 = pnand %p319_p6, %p316_p5 }
  0xc8   :  { %324 = shalt.err (!%p321_p7)
}
  0xc9   :  { %s332_s25 = smov 512   ;;  %s333_s26 = smov 32  }
  0xca   :  { %291 = dma.vmem_to_hbm [thread:$0]  %s286_s16, 1024, %s614_s1, [#allocation3], %s332_s25, %s332_s25, %s333_s26  }
  0xcb   :  { %325 = dma.done.wait [#allocation3], 1024  }
  0xcc   :  { %326 = vsyncadd [#allocation3], 4294966272 }
  0xcd   :  { %295 = vsyncpa [#allocation3], 1 }

</bundles_post_ra>
